<compile_context>
chip_gen: v7x
topology: tpu7x:2x2x1
jax: 0.10.0
libtpu: 0.0.40
codegen_flags: <defaults>
</compile_context>

<pallas_src>
import functools

import jax
import jax.numpy as jnp
from jax.experimental import pallas as pl
from jax.experimental.pallas import tpu as pltpu


_MIB = 1 << 20
# Stay well under v7x's 64 MiB physical VMEM (smallest across v5e/v6e/v7x),
# leaving headroom for compiler-internal scratch.
_RESIDENT_VMEM_BUDGET = 40 * _MIB


def _round_up(x, m):
    return ((x + m - 1) // m) * m


# --------------------------------------------------------------------------
# Kernels
# --------------------------------------------------------------------------

def mlp_resident_kernel(x_ref, w1_ref, w2_ref, o_ref):
    """Weights fully VMEM-resident (constant block index -> single HBM fetch)."""
    x = x_ref[...].astype(w1_ref.dtype)                       # in-kernel bf16 cast
    h = jnp.dot(x, w1_ref[...], preferred_element_type=jnp.float32)
    h = h * jax.nn.sigmoid(h)                                 # SiLU in f32 (v5e-safe)
    o_ref[...] = jnp.dot(h.astype(w2_ref.dtype), w2_ref[...],
                         preferred_element_type=jnp.float32).astype(o_ref.dtype)


def mlp_tiled_kernel_f32(x_ref, w1_ref, w2_ref, o_ref):
    """Hidden-dim tiled path, f32 output: accumulate directly into the
    VMEM-resident output block (its block index is constant across k)."""
    k = pl.program_id(1)
    x = x_ref[...].astype(w1_ref.dtype)
    h = jnp.dot(x, w1_ref[...], preferred_element_type=jnp.float32)
    h = h * jax.nn.sigmoid(h)
    p = jnp.dot(h.astype(w2_ref.dtype), w2_ref[...],
                preferred_element_type=jnp.float32)

    @pl.when(k == 0)
    def _():
        o_ref[...] = p

    @pl.when(k != 0)
    def _():
        o_ref[...] += p


def mlp_tiled_kernel(x_ref, w1_ref, w2_ref, o_ref, acc_ref):
    """Hidden-dim tiled path, narrow output dtype: f32 scratch accumulator."""
    k = pl.program_id(1)
    x = x_ref[...].astype(w1_ref.dtype)
    h = jnp.dot(x, w1_ref[...], preferred_element_type=jnp.float32)
    h = h * jax.nn.sigmoid(h)
    p = jnp.dot(h.astype(w2_ref.dtype), w2_ref[...],
                preferred_element_type=jnp.float32)

    @pl.when(k == 0)
    def _():
        acc_ref[...] = p

    @pl.when(k != 0)
    def _():
        acc_ref[...] += p

    @pl.when(k == pl.num_programs(1) - 1)
    def _():
        o_ref[...] = acc_ref[...].astype(o_ref.dtype)


# --------------------------------------------------------------------------
# Tile selection
# --------------------------------------------------------------------------

def _pick_tm(B):
    # >=2 batch tiles whenever B allows (v7x has 2 TensorCores sharing HBM),
    # capped at 512 rows, rounded to 16 (bf16 sublane packing).
    tm = min(512, _round_up(max(1, -(-B // 2)), 16))
    return max(16, min(tm, _round_up(B, 16)))


def _pick_th(H, target=1024):
    # Largest divisor of H that is a multiple of 256 (full-depth MXU contraction
    # on v6e/v7x) and <= target; fall back to 128-multiples (fine for v5e's
    # 128-wide MXU), then to the whole hidden dim.
    for align in (256, 128):
        best, d = 0, align
        while d <= min(H, target):
            if H % d == 0:
                best = d
            d += align
        if best:
            return best
    return H


# --------------------------------------------------------------------------
# Forward wrapper
# --------------------------------------------------------------------------

@functools.partial(jax.jit, static_argnames=("tm",))
def mlp_forward(x, w1t, w2t, *, tm=None):
    """out = silu(x @ w1t) @ w2t.

    x:   [B, D_in]   activations, native dtype (cast to bf16 inside the kernel)
    w1t: [D_in, H]   fc1.weight.T, stored bf16 at parameter-setup time
    w2t: [H, D_out]  fc2.weight.T, stored bf16 at parameter-setup time
    """
    B, D_in = x.shape
    d_in2, H = w1t.shape
    h2, D_out = w2t.shape
    assert D_in == d_in2 and H == h2, "weights must be [D_in,H] and [H,D_out]"
    out_dtype = x.dtype

    xb = jnp.dtype(x.dtype).itemsize
    wb = jnp.dtype(w1t.dtype).itemsize
    ob = jnp.dtype(out_dtype).itemsize

    if tm is None:
        tm = _pick_tm(B)
    tm = max(16, min(_round_up(tm, 16), _round_up(B, 16)))
    n_btiles = pl.cdiv(B, tm)

    weights_bytes = (D_in * H + H * D_out) * wb
    flops = 2 * B * (D_in * H + H * D_out)
    transcendentals = B * H  # sigmoid

    # Conservative VMEM estimate for the resident-weights fast path:
    # double-buffer every BlockSpec operand + in-kernel intermediates.
    resident_vmem = (
        2 * weights_bytes                                   # w1 + w2 blocks
        + 2 * tm * D_in * xb + 2 * tm * D_out * ob          # x / out blocks
        + tm * D_in * 2                                     # bf16 cast of x
        + tm * H * (4 + 2)                                  # f32 fc1 acc + bf16 SiLU
        + tm * D_out * 4                                    # f32 fc2 result
    )

    if resident_vmem <= _RESIDENT_VMEM_BUDGET:
        # ---------------- fast path: weights DMA'd exactly once ----------------
        vmem_limit = int(min(60 * _MIB, max(32 * _MIB, resident_vmem + 4 * _MIB)))
        cost = pl.CostEstimate(
            flops=flops,
            transcendentals=transcendentals,
            bytes_accessed=B * D_in * xb + weights_bytes + B * D_out * ob,
        )
        return pl.pallas_call(
            mlp_resident_kernel,
            out_shape=jax.ShapeDtypeStruct((B, D_out), out_dtype),
            grid_spec=pltpu.PrefetchScalarGridSpec(
                num_scalar_prefetch=0,
                grid=(n_btiles,),
                in_specs=[
                    pl.BlockSpec((tm, D_in), lambda i: (i, 0)),    # x batch tile
                    pl.BlockSpec((D_in, H), lambda i: (0, 0)),     # W1t (constant)
                    pl.BlockSpec((H, D_out), lambda i: (0, 0)),    # W2t (constant)
                ],
                out_specs=pl.BlockSpec((tm, D_out), lambda i: (i, 0)),
            ),
            compiler_params=pltpu.CompilerParams(
                dimension_semantics=("parallel",),
                vmem_limit_bytes=vmem_limit),
            cost_estimate=cost,
        )(x, w1t, w2t)

    # ---------------- fallback: hidden-dim tiled reduction ----------------
    # TODO(synk): for very large H with no 128-aligned divisor, th falls back to
    # H and may still exceed v7x VMEM; padding H would be needed in that case.
    th = _pick_th(H)
    grid = (n_btiles, H // th)

    use_scratch = out_dtype != jnp.float32
    tiled_vmem = (
        2 * (D_in * th + th * D_out) * wb
        + 2 * tm * D_in * xb + 2 * tm * D_out * ob
        + tm * D_in * 2 + tm * th * (4 + 2) + tm * D_out * 4
        + (tm * D_out * 4 if use_scratch else 0)
    )
    vmem_limit = int(min(60 * _MIB, max(32 * _MIB, tiled_vmem + 4 * _MIB)))
    cost = pl.CostEstimate(
        flops=flops,
        transcendentals=transcendentals,
        # weights are re-streamed once per batch tile on this path
        bytes_accessed=B * D_in * xb + int(n_btiles) * weights_bytes
                       + B * D_out * ob,
    )

    kernel = mlp_tiled_kernel if use_scratch else mlp_tiled_kernel_f32
    scratch = [pltpu.VMEM((tm, D_out), jnp.float32)] if use_scratch else []

    return pl.pallas_call(
        kernel,
        out_shape=jax.ShapeDtypeStruct((B, D_out), out_dtype),
        grid_spec=pltpu.PrefetchScalarGridSpec(
            num_scalar_prefetch=0,
            grid=grid,
            in_specs=[
                pl.BlockSpec((tm, D_in), lambda i, k: (i, 0)),    # x batch tile
                pl.BlockSpec((D_in, th), lambda i, k: (0, k)),    # W1t hidden slice
                pl.BlockSpec((th, D_out), lambda i, k: (k, 0)),   # W2t hidden slice
            ],
            out_specs=pl.BlockSpec((tm, D_out), lambda i, k: (i, 0)),
            scratch_shapes=scratch,
        ),
        compiler_params=pltpu.CompilerParams(
            dimension_semantics=("parallel", "arbitrary"),
            vmem_limit_bytes=vmem_limit),
        cost_estimate=cost,
    )(x, w1t, w2t)


def mlp_reference(x, w1, w2):
    h = x @ w1.T
    h = h * jax.nn.sigmoid(h)
    return h @ w2.T


if __name__ == "__main__":
    # Small shapes consistent with MLP(input_dim=128, output_dim=128, hidden_dim=512).
    B, D_in, H, D_out = 64, 128, 512, 128
    key = jax.random.PRNGKey(0)
    kx, k1, k2 = jax.random.split(key, 3)

    x = jax.random.normal(kx, (B, D_in), dtype=jnp.float32)
    # nn.Linear-style (bias=False) weights, deterministic init.
    w1 = jax.random.normal(k1, (H, D_in), dtype=jnp.float32) * (1.0 / D_in ** 0.5)
    w2 = jax.random.normal(k2, (D_out, H), dtype=jnp.float32) * (1.0 / H ** 0.5)

    # One-time parameter setup (NOT a per-call cost): pre-transposed, bf16.
    w1t = jnp.asarray(w1.T, dtype=jnp.bfloat16)   # [D_in, H]
    w2t = jnp.asarray(w2.T, dtype=jnp.bfloat16)   # [H, D_out]

    out = jax.block_until_ready(mlp_forward(x, w1t, w2t))

    ref = mlp_reference(x, w1, w2)
    assert out.shape == (B, D_out) and out.dtype == x.dtype
    # bf16 weights / in-kernel bf16 casts (f32 accumulation) vs f32 reference.
    assert jnp.allclose(out, ref, atol=5e-2, rtol=5e-2), "mismatch vs f32 reference"
    print("KERNEL_OK")
</pallas_src>

<mosaic_0001>
module attributes {stable_mosaic.version = 11 : i64} {
  func.func @mlp_resident_kernel(%arg0: i32, %arg1: memref<32x128xf32, #tpu.memory_space<vmem>>, %arg2: memref<128x512xbf16, #tpu.memory_space<vmem>>, %arg3: memref<512x128xbf16, #tpu.memory_space<vmem>>, %arg4: memref<32x128xf32, #tpu.memory_space<vmem>>) attributes {dimension_semantics = [#tpu.dimension_semantics<parallel>], iteration_bounds = array<i64: 2>, scalar_prefetch = 0 : i64, scratch_operands = 0 : i64, tpu.core_type = #tpu.core_type<tc>, window_params = [{transform_indices = @transform_0, window_bounds = array<i64: 32, 128>}, {pipeline_mode = #tpu.pipeline_mode<synchronous>, transform_indices = @transform_1, window_bounds = array<i64: 128, 512>}, {pipeline_mode = #tpu.pipeline_mode<synchronous>, transform_indices = @transform_2, window_bounds = array<i64: 512, 128>}, {transform_indices = @transform_3, window_bounds = array<i64: 32, 128>}]} {
    %c0 = arith.constant 0 : index
    %c0_0 = arith.constant 0 : index
    %0 = vector.load %arg1[%c0, %c0_0] : memref<32x128xf32, #tpu.memory_space<vmem>>, vector<32x128xf32>
    %1 = arith.truncf %0 : vector<32x128xf32> to vector<32x128xbf16>
    %c0_1 = arith.constant 0 : index
    %c0_2 = arith.constant 0 : index
    %2 = vector.load %arg2[%c0_1, %c0_2] : memref<128x512xbf16, #tpu.memory_space<vmem>>, vector<128x512xbf16>
    %cst = arith.constant dense<0.000000e+00> : vector<32x512xf32>
    %3 = tpu.matmul %1, %2, %cst {dimension_numbers = #tpu.dot_dimension_numbers<[1], [0], [0], [1], [0, 0, 1, 1], [], []>} : vector<32x128xbf16>, vector<128x512xbf16>, vector<32x512xf32> -> vector<32x512xf32>
    %4 = arith.negf %3 : vector<32x512xf32>
    %5 = math.exp %4 : vector<32x512xf32>
    %cst_3 = arith.constant 1.000000e+00 : f32
    %6 = vector.broadcast %cst_3 : f32 to vector<32x512xf32>
    %7 = arith.addf %6, %5 : vector<32x512xf32>
    %8 = arith.divf %6, %7 : vector<32x512xf32>
    %9 = arith.mulf %3, %8 : vector<32x512xf32>
    %10 = arith.truncf %9 : vector<32x512xf32> to vector<32x512xbf16>
    %c0_4 = arith.constant 0 : index
    %c0_5 = arith.constant 0 : index
    %11 = vector.load %arg3[%c0_4, %c0_5] : memref<512x128xbf16, #tpu.memory_space<vmem>>, vector<512x128xbf16>
    %cst_6 = arith.constant dense<0.000000e+00> : vector<32x128xf32>
    %12 = tpu.matmul %10, %11, %cst_6 {dimension_numbers = #tpu.dot_dimension_numbers<[1], [0], [0], [1], [0, 0, 1, 1], [], []>} : vector<32x512xbf16>, vector<512x128xbf16>, vector<32x128xf32> -> vector<32x128xf32>
    %c0_7 = arith.constant 0 : index
    %c0_8 = arith.constant 0 : index
    %13 = vector.load %arg4[%c0_7, %c0_8] : memref<32x128xf32, #tpu.memory_space<vmem>>, vector<32x128xf32>
    tpu.vector_store %arg4[%c0_7, %c0_8], %12 {strides = array<i32>} : memref<32x128xf32, #tpu.memory_space<vmem>>, vector<32x128xf32>,
    return
  }
  func.func @transform_0(%arg0: i32) -> (i32, i32) {
    %c0_i32 = arith.constant 0 : i32
    %c0_i32_0 = arith.constant 0 : i32
    return %arg0, %c0_i32 : i32, i32
  }
  func.func @transform_1(%arg0: i32) -> (i32, i32) {
    %c0_i32 = arith.constant 0 : i32
    %c0_i32_0 = arith.constant 0 : i32
    %c0_i32_1 = arith.constant 0 : i32
    return %c0_i32, %c0_i32_0 : i32, i32
  }
  func.func @transform_2(%arg0: i32) -> (i32, i32) {
    %c0_i32 = arith.constant 0 : i32
    %c0_i32_0 = arith.constant 0 : i32
    %c0_i32_1 = arith.constant 0 : i32
    return %c0_i32, %c0_i32_0 : i32, i32
  }
  func.func @transform_3(%arg0: i32) -> (i32, i32) {
    %c0_i32 = arith.constant 0 : i32
    %c0_i32_0 = arith.constant 0 : i32
    return %arg0, %c0_i32 : i32, i32
  }
}

</mosaic_0001>

<bundles_post_ra>
// kernel: mlp_forward.1
= control target key start
LH: loop header
LB: loop body
LE: loop exit
PB: predicated region body
PF: predicated region fallthrough
CT: control target
= control target key end

     0   :  { %8 = vsyncpa [#allocation3], 0  ;;  %s1988_s0 = inlined_call_operand.hbm [shape: f32[64,128], index: 0, kind: input, shape index: {}]   ;;  %s1989_s1 = inlined_call_operand.hbm [shape: bf16[128,512], index: 1, kind: input, shape index: {}]   ;;  %s1990_s2 = inlined_call_operand.hbm [shape: bf16[512,128], index: 2, kind: input, shape index: {}]   ;;  %s1991_s3 = inlined_call_operand.hbm [shape: f32[64,128], index: 3, kind: output, shape index: {}]  }
   0x1   :  { %10 = vsyncpa [#allocation3 + $0x1], 0 }
   0x2   :  { %11 = vsyncpa [#allocation6], 0 }
   0x3   :  { %12 = vsyncpa [#allocation4], 0 }
   0x4   :  { %14 = vsyncpa [#allocation4 + $0x1], 0  ;;  %s1676_s12 = smov 0   ;;  %s1678_s13 = smov 0  }
   0x5   :  { %s1680_s14 = smov 0   ;;  %s1682_s15 = smov 0  }
   0x6 LB: > { %s1697_s16 = sadd.s32 4294967295, %s1641_s15   ;;  %s1109_s17 = sadd.s32 4294967294, %s1641_s15   ;;  %s1641_s15 = sphi %s1682_s15, %s2011_s15   ;;  %s1637_s14 = sphi %s1680_s14, %s2010_s14   ;;  %s1633_s13 = sphi %s1678_s13, %s2009_s13   ;;  %s1629_s12 = sphi %s1676_s12, %s2008_s12  }
   0x7   : > { %p40_p0 = scmp.ne.s32.totalorder %s1633_s13, %s1629_s12  ;;  %p1992_p1 = scmp.eq.s32.totalorder %s1697_s16, 0 }
   0x8   : > { %p112_p3 = scmp.eq.s32.totalorder %s1109_s17, 1  ;;  %p1110_p5 = scmp.ge.s32.totalorder %s1641_s15, 1 }
   0x9   : > { %p1706_p4 = por %p1992_p1, %p40_p0  ;;  %p119_p7 = scmp.lt.s32.totalorder %s1641_s15, 3 }
   0xa   : > { %p1711_p6 = por %p112_p3, %p40_p0  ;;  %s1643_s21 = smov [#allocation5]  }
   0xb   : > { %s1995_s18 = scalar_select %p1706_p4, 1, 0 }
   0xc   : > { %s1996_s19 = scalar_select %p1711_p6, 1, 0 }
   0xd   : > { %p1716_p8 = pnand %p1110_p5, %p119_p7  ;;  %s131_s22 = sshll.u32 %s1643_s21, 4  ;;  %s1720_s22 = int_to_ptr.vmem [resolvable:$true] %s131_s22 }
   0xe   : > { %s1644_s24 = smov [#allocation7]   ;;  %s1485_s28 = scalar_lea.hbm %s1989_s1, 4096 }
   0xf   : > { %p1277_p9 = pneg %p1716_p8  ;;  %s144_s25 = sshll.u32 %s1644_s24, 4  ;;  %s1731_s25 = int_to_ptr.vmem [resolvable:$true] %s144_s25 }
  0x10   : > { %p1486_p12 = scmp.ne.s32.totalorder %s1989_s1, %s1485_s28  ;;  %p1492_p5 = scmp.lt.u32.totalorder %s1485_s28, %s1989_s1 }
  0x11   : > { %p1727_p11 = pnand %p1277_p9, %p1992_p1 }
  0x13   : > { %p1487_p13 = pneg %p1727_p11 }
  0x15   : > { %p1488_p0 = pnand %p1487_p13, %p1486_p12 }
  0x17   : > { %p1489_p3 = pneg %p1488_p0 }
  0x19   : > { %p1494_p7 = pnand %p1492_p5, %p1489_p3 }
  0x1b   : > { %1497 = shalt.err (!%p1494_p7)
}
  0x1c   : > { %s1498_s6 = scalar_lea.vmem %s1720_s22, 4096  ;;  %p1506_p2 = scmp.lt.s32.totalorder %s1720_s22, %s1720_s22 }
  0x1d   : > { %p1499_p9 = scmp.ne.s32.totalorder %s1720_s22, %s1498_s6  ;;  %p1507_p12 = scmp.lt.s32.totalorder %s1498_s6, %s1498_s6 }
  0x1f   : > { %p1501_p10 = pnand %p1499_p9, %p1487_p13  ;;  %p1508_p0 = por %p1507_p12, %p1506_p2 }
  0x21   : > { %p1502_p1 = pneg %p1501_p10 }
  0x23   : > { %p1509_p6 = pnand %p1508_p0, %p1502_p1 }
  0x25   : > { %1512 = shalt.err (!%p1509_p6)
}
  0x26   : > { %s1645_s7 = smov 256   ;;  %s1646_s8 = smov 16  }
  0x27   : > { %1280 = dma.hbm_to_vmem [thread:$0]  (!%p1727_p11), %s1989_s1, 4096, %s1720_s22, [#allocation6], %s1645_s7, %s1645_s7, %s1646_s8  }
  0x28   : > { %s1513_s21 = scalar_lea.hbm %s1990_s2, 4096 }
  0x29   : > { %p1514_p2 = scmp.ne.s32.totalorder %s1990_s2, %s1513_s21  ;;  %p1520_p10 = scmp.lt.u32.totalorder %s1513_s21, %s1990_s2 }
  0x2b   : > { %p1516_p1 = pnand %p1514_p2, %p1487_p13 }
  0x2d   : > { %p1517_p6 = pneg %p1516_p1 }
  0x2f   : > { %p1522_p3 = pnand %p1520_p10, %p1517_p6 }
  0x31   : > { %1525 = shalt.err (!%p1522_p3)
}
  0x32   : > { %s1526_s22 = scalar_lea.vmem %s1731_s25, 4096  ;;  %p1534_p12 = scmp.lt.s32.totalorder %s1731_s25, %s1731_s25 }
  0x33   : > { %p1527_p5 = scmp.ne.s32.totalorder %s1731_s25, %s1526_s22  ;;  %p1535_p0 = scmp.lt.s32.totalorder %s1526_s22, %s1526_s22 }
  0x35   : > { %p1529_p7 = pnand %p1527_p5, %p1487_p13  ;;  %p1536_p2 = por %p1535_p0, %p1534_p12 }
  0x37   : > { %p1530_p9 = pneg %p1529_p7 }
  0x39   : > { %p1537_p1 = pnand %p1536_p2, %p1530_p9 }
  0x3b   : > { %1540 = shalt.err (!%p1537_p1)
}
  0x3c   : > { %s1647_s29 = smov 64   ;;  %s1648_s30 = smov 4  }
  0x3d   : > { %1283 = dma.hbm_to_vmem [thread:$0]  (!%p1727_p11), %s1990_s2, 4096, %s1731_s25, [#allocation6], %s1647_s29, %s1647_s29, %s1648_s30  }
  0x3e   : > { %s1786_s6 = sadd.s32 1, %s1641_s15   ;;  %s27_s8 = sadd.s32 1, %s1637_s14 }
  0x3f   : > { %s24_s7 = ssub.s32 %s1641_s15, %s1786_s6  ;;  %p34_p6 = scmp.ne.s32.totalorder %s1637_s14, %s1633_s13 }
  0x40   : > { %p25_p13 = scmp.eq.s32.totalorder %s24_s7, 0  ;;  %p35_p10 = scmp.eq.s32.totalorder %s1641_s15, 0 }
  0x41   : > { %p1999_p5 = scmp.eq.s32.totalorder %s1697_s16, 1  ;;  %p1294_p9 = scmp.lt.s32.totalorder %s1641_s15, 2 }
  0x42   : > { %s1795_s9 = scalar_select %p25_p13, %s1637_s14, %s27_s8  }
  0x43   : > { %p36_p3 = por %p35_p10, %p34_p6  ;;  %p1799_p7 = por %p1999_p5, %p34_p6 }
  0x44   : > { %s158_s23 = sand.u32 1, %s1637_s14   ;;  %s1207_s25 = sshll.u32 %s1641_s15, 9 }
  0x45   : > { %s2000_s10 = scalar_select %p1799_p7, 1, 0 }
  0x46   : > { %s1114_s11 = sshll.u32 %s158_s23, 5  ;;  %s1809_s24 = scalar_lea.hbm %s1988_s0, %s1207_s25 }
  0x47   : > { %s162_s26 = scalar_lea.vmem [#allocation2], %s1114_s11  ;;  %p1813_p11 = pnand %p1294_p9, %p36_p3 }
  0x48   : > { %s169_s27 = sshll.u32 %s162_s26, 4  ;;  %s1817_s22 = scalar_lea.sflag [#allocation3], %s158_s23  ;;  %s1811_s27 = int_to_ptr.vmem [resolvable:$true] %s169_s27 }
  0x49   : > { %s1541_s29 = scalar_lea.hbm %s1809_s24, 512  ;;  %p1543_p0 = pneg %p1813_p11 }
  0x4a   : > { %p1542_p12 = scmp.ne.s32.totalorder %s1809_s24, %s1541_s29  ;;  %s1546_s5 = scalar_lea.hbm %s1988_s0, 1024 }
  0x4b   : > { %p1547_p13 = scmp.lt.u32.totalorder %s1809_s24, %s1988_s0  ;;  %p1548_p6 = scmp.lt.u32.totalorder %s1546_s5, %s1541_s29 }
  0x4c   : > { %p1544_p2 = pnand %p1543_p0, %p1542_p12  ;;  %p1550_p3 = scmp.lt.u32.totalorder %s1541_s29, %s1809_s24 }
  0x4d   : > { %p1549_p10 = por %p1548_p6, %p1547_p13 }
  0x4e   : > { %p1545_p1 = pneg %p1544_p2 }
  0x4f   : > { %p1551_p5 = por %p1550_p3, %p1549_p10 }
  0x51   : > { %p1552_p9 = pnand %p1551_p5, %p1545_p1 }
  0x53   : > { %1555 = shalt.err (!%p1552_p9)
}
  0x54   : > { %s1556_s23 = scalar_lea.vmem %s1811_s27, 512  ;;  %s1649_s11 = smov [#allocation2]  }
  0x55   : > { %p1557_p12 = scmp.ne.s32.totalorder %s1811_s27, %s1556_s23  ;;  %s1561_s25 = sshll.u32 %s1649_s11, 4  ;;  %s1562_s25 = int_to_ptr.vmem [resolvable:$false] %s1561_s25 }
  0x56   : > { %s1563_s17 = scalar_lea.vmem %s1562_s25, 1024  ;;  %p1564_p4 = scmp.lt.s32.totalorder %s1811_s27, %s1562_s25 }
  0x57   : > { %p1559_p2 = pnand %p1557_p12, %p1543_p0  ;;  %p1565_p13 = scmp.lt.s32.totalorder %s1563_s17, %s1556_s23 }
  0x59   : > { %p1560_p7 = pneg %p1559_p2  ;;  %p1566_p6 = por %p1565_p13, %p1564_p4 }
  0x5b   : > { %p1567_p10 = pnand %p1566_p6, %p1560_p7 }
  0x5d   : > { %1570 = shalt.err (!%p1567_p10)
}
  0x5e   : > { %s1650_s21 = smov 128   ;;  %s1651_s26 = smov 8  }
  0x5f   : > { %1287 = dma.hbm_to_vmem [thread:$0]  (!%p1813_p11), %s1809_s24, 512, %s1811_s27, %s1817_s22, %s1650_s21, %s1650_s21, %s1651_s26  }
  0x60   : > { %181 = sbr.rel (%p1716_p8) target bundleno = 645 (0x285), region = 32  ;;  %s1848_s29 = sand.u32 (!%p1716_p8), 1, %s1633_s13  }
  0x61   : > { %s1118_s30 = sshll.u32 (!%p1716_p8), %s1848_s29, 5  ;;  %s184_s4 = scalar_lea.sflag (!%p1716_p8), [#allocation3], %s1848_s29 }
  0x62   : > { %s1854_s5 = scalar_lea.vmem (!%p1716_p8), [#allocation2], %s1118_s30  ;;  %p2002_p4 = scmp.ne.s32.totalorder (!%p1716_p8), %s1995_s18, 0 }
  0x67   : > { %1616 = dma.done.wait (%p2002_p4), %s184_s4, 512  }
  0x68   : > { %1618 = vsyncadd (%p2002_p4), %s184_s4, 4294966784  ;;  %p2003_p7 = scmp.eq.s32.totalorder %s1697_s16, 0 }
  0x6a   : > { %1620 = dma.done.wait (%p2003_p7), [#allocation6], 8192   ;;  %p2004_p8 = pmov %p2003_p7 }
  0x6b   : > { %v1652_v0 = vmov 0   ;;  %v1341_v1 = vld [vmem:[#allocation5 + $0x4] ss:$16 sps:$4 sm:$0xff]   ;;  %v1343_v2 = vld [vmem:[#allocation5 + $0xc] ss:$16 sps:$4 sm:$0xff]   ;;  %s217_s18 = scalar_lea.vmem [#allocation8], %s1118_s30 }
  0x6c   : > { %1622 = vsyncadd (%p2004_p8), [#allocation6], 4294959104  ;;  %451 = vmatprep.mubr.bf16.mxu0 %v1652_v0  ;;  %504 = vmatprep.mubr.bf16.mxu1 %v1652_v0  ;;  %v1345_v3 = vld [vmem:[#allocation5] ss:$16 sps:$4 sm:$0xff]   ;;  %v1346_v4 = vld [vmem:[#allocation5 + $0x8] ss:$16 sps:$4 sm:$0xff]  }
  0x6d   : > { %419 = vmatprep.subr.bf16.mxu0 %v1341_v1  ;;  %472 = vmatprep.subr.bf16.mxu1 %v1343_v2  ;;  %v1347_v5 = vld [vmem:[#allocation5 + $0x24] ss:$16 sps:$4 sm:$0xff]   ;;  %v1349_v6 = vld [vmem:[#allocation5 + $0x2c] ss:$16 sps:$4 sm:$0xff]   ;;  %v1351_v7 = vld [vmem:[#allocation5 + $0x20] ss:$16 sps:$4 sm:$0xff]  }
  0x6e   : > { %420 = vmatpush1.bf16.msra.mxu0 %v1345_v3  ;;  %473 = vmatpush1.bf16.msra.mxu1 %v1346_v4  ;;  %v1352_v8 = vld [vmem:[#allocation5 + $0x28] ss:$16 sps:$4 sm:$0xff]   ;;  %v1353_v9 = vld [vmem:[#allocation5 + $0x44] ss:$16 sps:$4 sm:$0xff]   ;;  %v1355_v10 = vld [vmem:[#allocation5 + $0x4c] ss:$16 sps:$4 sm:$0xff]  }
  0x6f   : > { %421 = vmatprep.subr.bf16.mxu0 %v1347_v5  ;;  %474 = vmatprep.subr.bf16.mxu1 %v1349_v6  ;;  %v1357_v11 = vld [vmem:[#allocation5 + $0x40] ss:$16 sps:$4 sm:$0xff]   ;;  %v1358_v12 = vld [vmem:[#allocation5 + $0x48] ss:$16 sps:$4 sm:$0xff]   ;;  %v1359_v13 = vld [vmem:[#allocation5 + $0x64] ss:$16 sps:$4 sm:$0xff]  }
  0x70   : > { %v1361_v14 = vld [vmem:[#allocation5 + $0x6c] ss:$16 sps:$4 sm:$0xff]   ;;  %v1363_v15 = vld [vmem:[#allocation5 + $0x60] ss:$16 sps:$4 sm:$0xff]   ;;  %v1364_v16 = vld [vmem:[#allocation5 + $0x68] ss:$16 sps:$4 sm:$0xff]  }
  0x71   : > { %v1365_v17 = vld [vmem:[#allocation5 + $0x84] ss:$16 sps:$4 sm:$0xff]   ;;  %v1367_v18 = vld [vmem:[#allocation5 + $0x8c] ss:$16 sps:$4 sm:$0xff]   ;;  %v1369_v19 = vld [vmem:[#allocation5 + $0x80] ss:$16 sps:$4 sm:$0xff]  }
  0x72   : > { %422 = vmatpush1.bf16.msra.mxu0 %v1351_v7  ;;  %475 = vmatpush1.bf16.msra.mxu1 %v1352_v8  ;;  %v1370_v20 = vld [vmem:[#allocation5 + $0x88] ss:$16 sps:$4 sm:$0xff]   ;;  %v1371_v21 = vld [vmem:[#allocation5 + $0xa4] ss:$16 sps:$4 sm:$0xff]   ;;  %v1373_v22 = vld [vmem:[#allocation5 + $0xac] ss:$16 sps:$4 sm:$0xff]  }
  0x73   : > { %423 = vmatprep.subr.bf16.mxu0 %v1353_v9  ;;  %476 = vmatprep.subr.bf16.mxu1 %v1355_v10  ;;  %v1375_v23 = vld [vmem:[#allocation5 + $0xa0] ss:$16 sps:$4 sm:$0xff]   ;;  %v1376_v24 = vld [vmem:[#allocation5 + $0xa8] ss:$16 sps:$4 sm:$0xff]   ;;  %v1377_v25 = vld [vmem:[#allocation5 + $0xc4] ss:$16 sps:$4 sm:$0xff]  }
  0x74   : > { %v1379_v26 = vld [vmem:[#allocation5 + $0xcc] ss:$16 sps:$4 sm:$0xff]   ;;  %v1381_v27 = vld [vmem:[#allocation5 + $0xc0] ss:$16 sps:$4 sm:$0xff]   ;;  %v1382_v28 = vld [vmem:[#allocation5 + $0xc8] ss:$16 sps:$4 sm:$0xff]  }
  0x75   : > { %v1383_v29 = vld [vmem:[#allocation5 + $0xe4] ss:$16 sps:$4 sm:$0xff]   ;;  %v1385_v30 = vld [vmem:[#allocation5 + $0xec] ss:$16 sps:$4 sm:$0xff]   ;;  %v1387_v31 = vld [vmem:[#allocation5 + $0xe0] ss:$16 sps:$4 sm:$0xff]  }
  0x76   : > { %424 = vmatpush1.bf16.msra.mxu0 %v1357_v11  ;;  %477 = vmatpush1.bf16.msra.mxu1 %v1358_v12  ;;  %v1388_v32 = vld [vmem:[#allocation5 + $0xe8] ss:$16 sps:$4 sm:$0xff]   ;;  %v221_v33 = vld [vmem:[%s1854_s5] sm:$0xff]  ;;  %v223_v36 = vld [vmem:[%s1854_s5 + $0x10] sm:$0xff]  ;;  %s1017_s20 = sshll.u32 %s217_s18, 4  ;;  %s1208_s24 = sshll.u32 %s1697_s16, 9  ;;  %s1939_s20 = int_to_ptr.vmem [resolvable:$true] %s1017_s20 }
  0x77   : > { %425 = vmatprep.subr.bf16.mxu0 %v1359_v13  ;;  %478 = vmatprep.subr.bf16.mxu1 %v1361_v14  ;;  %v222_v34 = vld [vmem:[%s1854_s5 + $0x8] sm:$0xff]  ;;  %v224_v37 = vld [vmem:[%s1854_s5 + $0x18] sm:$0xff]  ;;  %v1389_v39 = vld [vmem:[#allocation7 + $0x40] sm:$0xff]   ;;  %s1944_s22 = scalar_lea.hbm %s1991_s3, %s1208_s24  ;;  %s1004_s7 = scalar_lea.sflag [#allocation4], %s1848_s29 }
  0x78   : > { %v225_v35 = vpack.c.bf16 %v222_v34, %v221_v33  ;;  %v226_v38 = vpack.c.bf16 %v224_v37, %v223_v36  ;;  %v1390_v40 = vld [vmem:[#allocation7 + $0xc0] sm:$0xff]   ;;  %v1393_v43 = vld [vmem:[#allocation7 + $0x48] sm:$0xff]   ;;  %v1397_v47 = vld [vmem:[#allocation7 + $0x50] sm:$0xff]   ;;  %s1571_s8 = scalar_lea.vmem %s1939_s20, 512  ;;  %p2005_p0 = scmp.ne.s32.totalorder %s2000_s10, 0 }
  0x79   : > { %v1391_v41 = vld [vmem:[#allocation7] sm:$0xff]   ;;  %v1394_v44 = vld [vmem:[#allocation7 + $0xc8] sm:$0xff]   ;;  %v1398_v48 = vld [vmem:[#allocation7 + $0xd0] sm:$0xff]   ;;  %p1572_p11 = scmp.ne.s32.totalorder %s1939_s20, %s1571_s8  ;;  %s1653_s16 = smov [#allocation8]  }
  0x7a   : > { %426 = vmatpush1.bf16.msra.mxu0 %v1363_v15  ;;  %479 = vmatpush1.bf16.msra.mxu1 %v1364_v16  ;;  %v1392_v42 = vld [vmem:[#allocation7 + $0x80] sm:$0xff]   ;;  %v1395_v45 = vld [vmem:[#allocation7 + $0x8] sm:$0xff]   ;;  %v1399_v49 = vld [vmem:[#allocation7 + $0x10] sm:$0xff]   ;;  %s1575_s23 = sshll.u32 %s1653_s16, 4  ;;  %s1576_s23 = int_to_ptr.vmem [resolvable:$false] %s1575_s23 }
  0x7b   : > { %427 = vmatprep.subr.bf16.mxu0 %v1365_v17  ;;  %480 = vmatprep.subr.bf16.mxu1 %v1367_v18  ;;  %v1396_v46 = vld [vmem:[#allocation7 + $0x88] sm:$0xff]   ;;  %v1400_v50 = vld [vmem:[#allocation7 + $0x90] sm:$0xff]   ;;  %v1401_v51 = vld [vmem:[#allocation7 + $0x58] sm:$0xff]   ;;  %p1573_p1 = pnand %p1572_p11, %p2005_p0  ;;  %s1577_s11 = scalar_lea.vmem %s1576_s23, 1024 }
  0x7c   : > { %v1402_v52 = vld [vmem:[#allocation7 + $0xd8] sm:$0xff]   ;;  %v1405_v55 = vld [vmem:[#allocation7 + $0x60] sm:$0xff]   ;;  %v1409_v59 = vld [vmem:[#allocation7 + $0x68] sm:$0xff]   ;;  %p1578_p5 = scmp.lt.s32.totalorder %s1939_s20, %s1576_s23  ;;  %p1579_p9 = scmp.lt.s32.totalorder %s1577_s11, %s1571_s8 }
  0x7d   : > { %v1403_v53 = vld [vmem:[#allocation7 + $0x18] sm:$0xff]   ;;  %v1406_v56 = vld [vmem:[#allocation7 + $0xe0] sm:$0xff]   ;;  %v1410_v60 = vld [vmem:[#allocation7 + $0xe8] sm:$0xff]   ;;  %p1574_p3 = pneg %p1573_p1 }
  0x7e   : > { %428 = vmatpush1.bf16.msra.mxu0 %v1369_v19  ;;  %481 = vmatpush1.bf16.msra.mxu1 %v1370_v20  ;;  %v1404_v54 = vld [vmem:[#allocation7 + $0x98] sm:$0xff]   ;;  %v1407_v57 = vld [vmem:[#allocation7 + $0x20] sm:$0xff]   ;;  %v1411_v61 = vld [vmem:[#allocation7 + $0x28] sm:$0xff]   ;;  %p1580_p12 = por %p1579_p9, %p1578_p5 }
  0x7f   : > { %429 = vmatprep.subr.bf16.mxu0 %v1371_v21  ;;  %482 = vmatprep.subr.bf16.mxu1 %v1373_v22  ;;  %v1408_v58 = vld [vmem:[#allocation7 + $0xa0] sm:$0xff]   ;;  %v1412_v62 = vld [vmem:[#allocation7 + $0xa8] sm:$0xff]   ;;  %v1413_v63 = vld [vmem:[#allocation7 + $0x70] sm:$0xff]  }
  0x80   : > { %v1415_v1 = vld [vmem:[#allocation7 + $0x30] sm:$0xff]   ;;  %v1417_v3 = vld [vmem:[#allocation7 + $0x78] sm:$0xff]   ;;  %p1581_p2 = pnand %p1580_p12, %p1574_p3 }
  0x81   : > { %v1416_v2 = vld [vmem:[#allocation7 + $0xb0] sm:$0xff]   ;;  %v1418_v4 = vld [vmem:[#allocation7 + $0xf8] sm:$0xff]  }
  0x82   : > { %430 = vmatpush1.bf16.msra.mxu0 %v1375_v23  ;;  %483 = vmatpush1.bf16.msra.mxu1 %v1376_v24  ;;  %v1419_v5 = vld [vmem:[#allocation7 + $0x38] sm:$0xff]  }
  0x83   : > { %431 = vmatprep.subr.bf16.mxu0 %v1377_v25  ;;  %484 = vmatprep.subr.bf16.mxu1 %v1379_v26  ;;  %v1420_v6 = vld [vmem:[#allocation7 + $0xb8] sm:$0xff]  }
  0x86   : > { %432 = vmatpush1.bf16.msra.mxu0 %v1381_v27  ;;  %485 = vmatpush1.bf16.msra.mxu1 %v1382_v28 }
  0x87   : > { %433 = vmatprep.subr.bf16.mxu0 %v1383_v29  ;;  %486 = vmatprep.subr.bf16.mxu1 %v1385_v30 }
  0x8a   : > { %434 = vmatpush1.bf16.msra.mxu0 %v1387_v31  ;;  %487 = vmatpush1.bf16.msra.mxu1 %v1388_v32 }
  0x8b   : > { %1209 = vmatprep.subr.bf16.mxu0 %v1389_v39  ;;  %1237 = vmatprep.subr.bf16.mxu1 %v1390_v40 }
  0x8d   : > { %452 = vmatmul.mubr.bf16.vlgmr.msra.gmra.mrb[0].mxu0 %v225_v35  ;;  %505 = vmatmul.mubr.bf16.vlgmr.msra.gmra.mrb[0].mxu1 %v225_v35 }
  0x8e   : > { %461 = vmatprep.mubr.bf16.mxu0 %v1652_v0  ;;  %514 = vmatprep.mubr.bf16.mxu1 %v1652_v0  ;;  %v1414_v0 = vld [vmem:[#allocation7 + $0xf0] sm:$0xff]  }
  0x8f   : > { %1210 = vmatpush3.bf16.msra.mxu0 %v1391_v41  ;;  %1238 = vmatpush3.bf16.msra.mxu1 %v1392_v42 }
  0x90   : > { %1211 = vmatprep.subr.bf16.mxu0 %v1393_v43  ;;  %1239 = vmatprep.subr.bf16.mxu1 %v1394_v44 }
  0x93   : > { %1212 = vmatpush3.bf16.msra.mxu0 %v1395_v45  ;;  %1240 = vmatpush3.bf16.msra.mxu1 %v1396_v46 }
  0x94   : > { %1213 = vmatprep.subr.bf16.mxu0 %v1397_v47  ;;  %1241 = vmatprep.subr.bf16.mxu1 %v1398_v48 }
  0x95   : > { %462 = vmatmul.mubr.bf16.gmra.mrb[4].mxu0 %v226_v38  ;;  %515 = vmatmul.mubr.bf16.gmra.mrb[4].mxu1 %v226_v38 }
  0x97   : > { %1214 = vmatpush3.bf16.msra.mxu0 %v1399_v49  ;;  %1242 = vmatpush3.bf16.msra.mxu1 %v1400_v50 }
  0x98   : > { %1215 = vmatprep.subr.bf16.mxu0 %v1401_v51  ;;  %1243 = vmatprep.subr.bf16.mxu1 %v1402_v52 }
  0x9b   : > { %1216 = vmatpush3.bf16.msra.mxu0 %v1403_v53  ;;  %1244 = vmatpush3.bf16.msra.mxu1 %v1404_v54 }
  0x9c   : > { %1217 = vmatprep.subr.bf16.mxu0 %v1405_v55  ;;  %1245 = vmatprep.subr.bf16.mxu1 %v1406_v56 }
  0x9f   : > { %1218 = vmatpush3.bf16.msra.mxu0 %v1407_v57  ;;  %1246 = vmatpush3.bf16.msra.mxu1 %v1408_v58 }
  0xa0   : > { %1219 = vmatprep.subr.bf16.mxu0 %v1409_v59  ;;  %1247 = vmatprep.subr.bf16.mxu1 %v1410_v60 }
  0xa3   : > { %1220 = vmatpush3.bf16.msra.mxu0 %v1411_v61  ;;  %1248 = vmatpush3.bf16.msra.mxu1 %v1412_v62 }
  0xa4   : > { %1221 = vmatprep.subr.bf16.mxu0 %v1413_v63  ;;  %1249 = vmatprep.subr.bf16.mxu1 %v1414_v0 }
  0xa7   : > { %1222 = vmatpush3.bf16.msra.mxu0 %v1415_v1  ;;  %1250 = vmatpush3.bf16.msra.mxu1 %v1416_v2 }
  0xa8   : > { %1223 = vmatprep.subr.bf16.mxu0 %v1417_v3  ;;  %1251 = vmatprep.subr.bf16.mxu1 %v1418_v4 }
  0xab   : > { %1224 = vmatpush3.bf16.msra.mxu0 %v1419_v5  ;;  %1252 = vmatpush3.bf16.msra.mxu1 %v1420_v6 }
 0x160   : > { %v1872_v7 = vpop.f32.mrb[0].mxu0  ;;  %v1874_v8 = vpop.f32.mrb[0].mxu1 }
 0x161   : > { %v1154_v9 = vmul.f32 -1.442695, %v1872_v7  ;;  %v1156_v10 = vmul.f32 -1.442695, %v1874_v8  ;;  %v1878_v11 = vpop.f32.mrb[1].mxu0  ;;  %v1880_v12 = vpop.f32.mrb[1].mxu1 }
 0x162   : > { %v1155_v13 = vmul.f32 -1.442695, %v1878_v11  ;;  %v1157_v14 = vmul.f32 -1.442695, %v1880_v12  ;;  %v1884_v15 = vpop.f32.mrb[2].mxu0  ;;  %v1886_v16 = vpop.f32.mrb[2].mxu1 }
 0x163   : > { %1421 = vpow2.f32 %v1154_v9  ;;  %v1158_v17 = vmul.f32 -1.442695, %v1884_v15  ;;  %v1889_v18 = vpop.f32.mrb[3].mxu0  ;;  %v1891_v19 = vpop.f32.mrb[3].mxu1  ;;  %v1160_v20 = vmul.f32 -1.442695, %v1886_v16 }
 0x164   : > { %1423 = vpow2.f32 %v1156_v10  ;;  %v1159_v21 = vmul.f32 -1.442695, %v1889_v18  ;;  %v1161_v22 = vmul.f32 -1.442695, %v1891_v19 }
 0x165   : > { %1425 = vpow2.f32 %v1155_v13 }
 0x166   : > { %1427 = vpow2.f32 %v1157_v14 }
 0x167   : > { %1429 = vpow2.f32 %v1158_v17 }
 0x168   : > { %1431 = vpow2.f32 %v1160_v20  ;;  %v1896_v23 = vpop.f32.mrb[4].mxu0  ;;  %v1898_v24 = vpop.f32.mrb[4].mxu1 }
 0x169   : > { %1433 = vpow2.f32 %v1159_v21  ;;  %v1162_v25 = vmul.f32 -1.442695, %v1896_v23  ;;  %v1164_v26 = vmul.f32 -1.442695, %v1898_v24  ;;  %v1902_v27 = vpop.f32.mrb[5].mxu0  ;;  %v1904_v28 = vpop.f32.mrb[5].mxu1 }
 0x16a   : > { %1435 = vpow2.f32 %v1161_v22  ;;  %v1163_v29 = vmul.f32 -1.442695, %v1902_v27  ;;  %v1907_v30 = vpop.f32.mrb[6].mxu0  ;;  %v1909_v31 = vpop.f32.mrb[6].mxu1  ;;  %v1165_v50 = vmul.f32 -1.442695, %v1904_v28 }
 0x16b   : > { %1437 = vpow2.f32 %v1162_v25  ;;  %v1166_v32 = vmul.f32 -1.442695, %v1907_v30  ;;  %v1912_v33 = vpop.f32.mrb[7].mxu0  ;;  %v1914_v34 = vpop.f32.mrb[7].mxu1  ;;  %v1168_v57 = vmul.f32 -1.442695, %v1909_v31 }
 0x16c   : > { %1439 = vpow2.f32 %v1164_v26  ;;  %v1167_v60 = vmul.f32 -1.442695, %v1912_v33  ;;  %v1169_v62 = vmul.f32 -1.442695, %v1914_v34 }
 0x16d   : > { %v1422_v35 = vpop.eup %1421  ;;  %1441 = vpow2.f32 %v1163_v29 }
 0x16e   : > { %v1424_v36 = vpop.eup %1423  ;;  %v573_v37 = vadd.f32 1.0, %v1422_v35  ;;  %1443 = vpow2.f32 %v1166_v32 }
 0x16f   : > { %v1426_v38 = vpop.eup %1425  ;;  %v575_v39 = vadd.f32 1.0, %v1424_v36 }
 0x170   : > { %v1428_v40 = vpop.eup %1427  ;;  %1445 = vrcp.f32 %v573_v37  ;;  %v574_v41 = vadd.f32 1.0, %v1426_v38 }
 0x171   : > { %v1430_v42 = vpop.eup %1429  ;;  %1447 = vrcp.f32 %v575_v39  ;;  %v576_v43 = vadd.f32 1.0, %v1428_v40 }
 0x172   : > { %v1432_v44 = vpop.eup %1431  ;;  %1449 = vrcp.f32 %v574_v41  ;;  %v577_v45 = vadd.f32 1.0, %v1430_v42 }
 0x173   : > { %v1434_v46 = vpop.eup %1433  ;;  %1451 = vrcp.f32 %v576_v43  ;;  %v579_v47 = vadd.f32 1.0, %v1432_v44 }
 0x174   : > { %v1436_v48 = vpop.eup %1435  ;;  %1453 = vrcp.f32 %v577_v45  ;;  %v578_v49 = vadd.f32 1.0, %v1434_v46 }
 0x175   : > { %v1438_v51 = vpop.eup %1437  ;;  %1455 = vrcp.f32 %v579_v47  ;;  %v580_v52 = vadd.f32 1.0, %v1436_v48 }
 0x176   : > { %1457 = vrcp.f32 %v578_v49  ;;  %v581_v53 = vadd.f32 1.0, %v1438_v51  ;;  %v1440_v54 = vpop.eup %1439 }
 0x177   : > { %1459 = vrcp.f32 %v580_v52  ;;  %v1442_v55 = vpop.eup %1441 }
 0x178   : > { %1461 = vpow2.f32 %v1165_v50  ;;  %v1444_v56 = vpop.eup %1443  ;;  %v582_v32 = vadd.f32 1.0, %v1442_v55 }
 0x179   : > { %1463 = vrcp.f32 %v581_v53  ;;  %v585_v59 = vadd.f32 1.0, %v1444_v56 }
 0x17a   : > { %v1446_v58 = vpop.eup %1445 }
 0x17b   : > { %v1448_v61 = vpop.eup %1447  ;;  %1465 = vrcp.f32 %v585_v59  ;;  %v621_v3 = vmul.f32 %v1446_v58, %v1872_v7 }
 0x17c   : > { %v1450_v63 = vpop.eup %1449  ;;  %1467 = vpow2.f32 %v1168_v57  ;;  %v623_v6 = vmul.f32 %v1448_v61, %v1874_v8 }
 0x17d   : > { %v1452_v0 = vpop.eup %1451  ;;  %1469 = vpow2.f32 %v1167_v60  ;;  %v622_v13 = vmul.f32 %v1450_v63, %v1878_v11 }
 0x17e   : > { %v1454_v1 = vpop.eup %1453  ;;  %1471 = vpow2.f32 %v1169_v62  ;;  %v624_v21 = vmul.f32 %v1452_v0, %v1880_v12 }
 0x17f   : > { %v1456_v2 = vpop.eup %1455  ;;  %v625_v4 = vmul.f32 %v1454_v1, %v1884_v15  ;;  %v583_v15 = vadd.f32 1.0, %v1440_v54 }
 0x180   : > { %v1458_v5 = vpop.eup %1457  ;;  %v627_v9 = vmul.f32 %v1456_v2, %v1886_v16 }
 0x181   : > { %v1460_v10 = vpop.eup %1459  ;;  %v637_v14 = vpack.c.bf16 %v625_v4, %v621_v3  ;;  %v626_v17 = vmul.f32 %v1458_v5, %v1889_v18  ;;  %1473 = vrcp.f32 %v583_v15 }
 0x182   : > { %v1462_v20 = vpop.eup %1461  ;;  %v639_v22 = vpack.c.bf16 %v627_v9, %v623_v6  ;;  %v628_v7 = vmul.f32 %v1460_v10, %v1891_v19  ;;  %1475 = vrcp.f32 %v582_v32 }
 0x183   : > { %v638_v25 = vpack.c.bf16 %v626_v17, %v622_v13  ;;  %v1464_v26 = vpop.eup %1463  ;;  %v584_v8 = vadd.f32 1.0, %v1462_v20 }
 0x184   : > { %v640_v29 = vpack.c.bf16 %v628_v7, %v624_v21  ;;  %v629_v35 = vmul.f32 %v1464_v26, %v1896_v23 }
 0x185   : > { %933 = vmatprep.mubr.bf16.mxu0 %v638_v25  ;;  %v1466_v16 = vpop.eup %1465  ;;  %1477 = vrcp.f32 %v584_v8 }
 0x186   : > { %982 = vmatprep.mubr.bf16.mxu1 %v640_v29  ;;  %934 = vmatmul.mubr.bf16.vlgmr.msra.gmra.mrb[8].mxu0 %v637_v14  ;;  %v1468_v11 = vpop.eup %1467  ;;  %v633_v18 = vmul.f32 %v1466_v16, %v1907_v30 }
 0x187   : > { %983 = vmatmul.mubr.bf16.vlgmr.msra.gmra.mrb[8].mxu1 %v639_v22  ;;  %v1470_v12 = vpop.eup %1469  ;;  %v587_v19 = vadd.f32 1.0, %v1468_v11 }
 0x188   : > { %v1472_v36 = vpop.eup %1471  ;;  %v641_v37 = vpack.c.bf16 %v633_v18, %v629_v35  ;;  %v586_v38 = vadd.f32 1.0, %v1470_v12 }
 0x189   : > { %1479 = vrcp.f32 %v587_v19  ;;  %v588_v39 = vadd.f32 1.0, %v1472_v36 }
 0x18a   : > { %1481 = vrcp.f32 %v586_v38 }
 0x18b   : > { %1483 = vrcp.f32 %v588_v39  ;;  %v1474_v40 = vpop.eup %1473 }
 0x18c   : > { %v1476_v41 = vpop.eup %1475  ;;  %v631_v44 = vmul.f32 %v1474_v40, %v1898_v24 }
 0x18d   : > { %v630_v46 = vmul.f32 %v1476_v41, %v1902_v27 }
 0x18f   : > { %v1478_v42 = vpop.eup %1477 }
 0x190   : > { %v632_v48 = vmul.f32 %v1478_v42, %v1904_v28 }
 0x193   : > { %v1480_v43 = vpop.eup %1479 }
 0x194   : > { %v1482_v23 = vpop.eup %1481  ;;  %v635_v30 = vmul.f32 %v1480_v43, %v1909_v31 }
 0x195   : > { %v1484_v45 = vpop.eup %1483  ;;  %v634_v47 = vmul.f32 %v1482_v23, %v1912_v33 }
 0x196   : > { %v643_v49 = vpack.c.bf16 %v635_v30, %v631_v44  ;;  %v636_v50 = vmul.f32 %v1484_v45, %v1914_v34 }
 0x197   : > { %v642_v51 = vpack.c.bf16 %v634_v47, %v630_v46 }
 0x198   : > { %v644_v52 = vpack.c.bf16 %v636_v50, %v632_v48 }
 0x199   : > { %941 = vmatprep.mubr.bf16.mxu0 %v642_v51 }
 0x19a   : > { %990 = vmatprep.mubr.bf16.mxu1 %v644_v52  ;;  %942 = vmatmul.mubr.bf16.gmra.mrb[12].mxu0 %v641_v37 }
 0x19b   : > { %991 = vmatmul.mubr.bf16.gmra.mrb[12].mxu1 %v643_v49 }
 0x259   : > { %v1225_v24 = vpop.f32.mrb[8].mxu0 }
 0x25a   : > { %v1253_v53 = vpop.f32.mrb[8].mxu1  ;;  %v1226_v31 = vpop.f32.mrb[9].mxu0 }
 0x25b   : > { %v1227_v54 = vadd.f32 %v1226_v31, %v1225_v24  ;;  %v1254_v55 = vpop.f32.mrb[9].mxu1  ;;  %v1228_v27 = vpop.f32.mrb[10].mxu0 }
 0x25c   : > { %v1255_v56 = vadd.f32 %v1254_v55, %v1253_v53  ;;  %v1256_v33 = vpop.f32.mrb[10].mxu1  ;;  %v1229_v57 = vpop.f32.mrb[11].mxu0 }
 0x25d   : > { %v1230_v28 = vadd.f32 %v1229_v57, %v1228_v27  ;;  %v1257_v58 = vpop.f32.mrb[11].mxu1 }
 0x25e   : > { %v985_v59 = vadd.f32 %v1255_v56, %v1227_v54  ;;  %v1258_v34 = vadd.f32 %v1257_v58, %v1256_v33 }
 0x260   : > { %999 = vst [vmem:[%s217_s18] sm:$0xff] %v985_v59  ;;  %v988_v60 = vadd.f32 %v1258_v34, %v1230_v28 }
 0x262   : > { %1000 = vst [vmem:[%s217_s18 + $0x8] sm:$0xff] %v988_v60 }
 0x26d   : > { %v1231_v61 = vpop.f32.mrb[12].mxu0 }
 0x26e   : > { %v1259_v62 = vpop.f32.mrb[12].mxu1  ;;  %v1232_v63 = vpop.f32.mrb[13].mxu0 }
 0x26f   : > { %v1233_v0 = vadd.f32 %v1232_v63, %v1231_v61  ;;  %v1260_v1 = vpop.f32.mrb[13].mxu1  ;;  %v1234_v2 = vpop.f32.mrb[14].mxu0 }
 0x270   : > { %v1261_v3 = vadd.f32 %v1260_v1, %v1259_v62  ;;  %v1262_v4 = vpop.f32.mrb[14].mxu1  ;;  %v1235_v5 = vpop.f32.mrb[15].mxu0 }
 0x271   : > { %v1236_v6 = vadd.f32 %v1235_v5, %v1234_v2  ;;  %v1263_v9 = vpop.f32.mrb[15].mxu1 }
 0x272   : > { %v993_v10 = vadd.f32 %v1261_v3, %v1233_v0  ;;  %v1264_v13 = vadd.f32 %v1263_v9, %v1262_v4 }
 0x274   : > { %1001 = vst [vmem:[%s217_s18 + $0x10] sm:$0xff] %v993_v10  ;;  %v996_v14 = vadd.f32 %v1264_v13, %v1236_v6 }
 0x276   : > { %1002 = vst [vmem:[%s217_s18 + $0x18] sm:$0xff] %v996_v14 }
 0x277   : > { %1584 = shalt.err (!%p1581_p2)
}
 0x278   : > { %s1585_s25 = scalar_lea.hbm %s1944_s22, 512  ;;  %s1589_s26 = scalar_lea.hbm %s1991_s3, 1024 }
 0x279   : > { %p1586_p13 = scmp.ne.s32.totalorder %s1944_s22, %s1585_s25  ;;  %p1590_p4 = scmp.lt.u32.totalorder %s1944_s22, %s1991_s3 }
 0x27a   : > { %p1591_p7 = scmp.lt.u32.totalorder %s1589_s26, %s1585_s25  ;;  %p1593_p11 = scmp.lt.u32.totalorder %s1585_s25, %s1944_s22 }
 0x27b   : > { %p1587_p6 = pnand %p1586_p13, %p2005_p0 }
 0x27c   : > { %p1592_p8 = por %p1591_p7, %p1590_p4 }
 0x27d   : > { %p1588_p10 = pneg %p1587_p6 }
 0x27e   : > { %p1594_p1 = por %p1593_p11, %p1592_p8 }
 0x280   : > { %p1595_p3 = pnand %p1594_p1, %p1588_p10 }
 0x282   : > { %1598 = shalt.err (!%p1595_p3)
}
 0x283   : > { %s1654_s5 = smov 128   ;;  %s1655_s18 = smov 8  }
 0x284   : > { %1275 = dma.vmem_to_hbm [thread:$0]  (%p2005_p0), %s1939_s20, 512, %s1944_s22, %s1004_s7, %s1654_s5, %s1654_s5, %s1655_s18  }
 0x285 PF: > { %s1032_s24 = sand.u32 1, %s1629_s12   ;;  %p2006_p5 = scmp.ne.s32.totalorder %s1996_s19, 0 }
 0x286   : > { %p2007_p9 = scmp.ge.s32.totalorder %s1641_s15, 2  ;;  %s1033_s27 = scalar_lea.sflag [#allocation4], %s1032_s24 }
 0x288   : > { %p1289_p12 = pnand %p2007_p9, %p2006_p5 }
 0x28a   : > { %1624 = dma.done.wait (!%p1289_p12), %s1033_s27, 512  }
 0x28b   : > { %1626 = vsyncadd (!%p1289_p12), %s1033_s27, 4294966784  ;;  %p17_p2 = scmp.ge.s32.totalorder %s1786_s6, 4   ;;  %s2008_s12 = smov %s1633_s13 }
 0x28c   : > { %s2009_s13 = smov %s1637_s14  ;;  %s2010_s14 = smov %s1795_s9 }
 0x28d   : > { %s2011_s15 = smov %s1786_s6  ;;  %19 = sbr.rel (!%p17_p2) target bundleno = 6 (0x6), region = 85 }
 0x294   :  { %1038 = vsyncpa [#allocation3], 1 }
 0x295   :  { %1040 = vsyncpa [#allocation3 + $0x1], 1 }
 0x296   :  { %1041 = vsyncpa [#allocation6], 1 }
 0x297   :  { %1042 = vsyncpa [#allocation4], 1 }
 0x298   :  { %1044 = vsyncpa [#allocation4 + $0x1], 1 }

</bundles_post_ra>
